<compile_context>
chip_gen: v7x
topology: tpu7x:2x2x1
jax: 0.10.0
libtpu: 0.0.40
codegen_flags: <defaults>
</compile_context>

<pallas_src>
import jax
import jax.numpy as jnp
from jax.experimental import pallas as pl
from jax.experimental.pallas import tpu as pltpu

HIDDEN_SIZES = (64, 64)

# Max rows of the (possibly packed) batch processed per grid step.
DEFAULT_BLOCK_ROWS = 4096


def _round_up(n, m):
    return ((n + m - 1) // m) * m


def _choose_tile(rows, block_rows):
    """Multiple of 8 sublanes; aim for >= 2 grid blocks (v7x megacore) when the
    batch is large enough; cap at block_rows to bound per-step VMEM."""
    half = _round_up(-(-rows // 2), 8)          # cdiv(rows, 2), rounded to 8
    return max(8, min(block_rows, half))


def _softplus(z):
    # Numerically stable softplus: max(z, 0) + log1p(exp(-|z|)).
    return jnp.maximum(z, 0.0) + jnp.log1p(jnp.exp(-jnp.abs(z)))


def cts_beta_policy_kernel(x_ref, w1_ref, b1_ref, w2_ref, b2_ref,
                           wh_ref, bh_ref, out_ref):
    x = x_ref[...]

    # Hidden layer 1: Linear + tanh (MXU matmul, VPU add, EUP tanh).
    h1 = jnp.tanh(
        jnp.dot(x, w1_ref[...], preferred_element_type=jnp.float32) + b1_ref[...]
    )
    # Hidden layer 2: Linear + tanh.
    h2 = jnp.tanh(
        jnp.dot(h1, w2_ref[...], preferred_element_type=jnp.float32) + b2_ref[...]
    )
    # Fused alpha/beta heads: one matmul, one softplus, one lane-merged store.
    z = jnp.dot(h2, wh_ref[...], preferred_element_type=jnp.float32) + bh_ref[...]
    out_ref[...] = _softplus(z) + 1.0


def _block_diag2(w):
    """Return [[w, 0], [0, w]] of shape (2*in, 2*out)."""
    i, o = w.shape
    z = jnp.zeros((i, o), w.dtype)
    top = jnp.concatenate([w, z], axis=1)
    bot = jnp.concatenate([z, w], axis=1)
    return jnp.concatenate([top, bot], axis=0)


def prepare_params(params):
    """Build fused-head and 2-row-packed weight sets ONCE (hoisted out of the
    forward hot path)."""
    wh = jnp.concatenate([params["wa"], params["wb"]], axis=1)   # (64, 2A)
    bh = jnp.concatenate([params["ba"], params["bb"]], axis=1)   # (1, 2A)
    flat = {
        "w1": params["w1"], "b1": params["b1"],
        "w2": params["w2"], "b2": params["b2"],
        "wh": wh, "bh": bh,
    }
    packed = {
        "w1": _block_diag2(params["w1"]), "b1": jnp.tile(params["b1"], (1, 2)),
        "w2": _block_diag2(params["w2"]), "b2": jnp.tile(params["b2"], (1, 2)),
        "wh": _block_diag2(wh),           "bh": jnp.tile(bh, (1, 2)),
    }
    return {"flat": flat, "packed": packed, "action_dim": params["wa"].shape[1]}


def cts_beta_policy_forward(x, prepared, block_rows=DEFAULT_BLOCK_ROWS):
    """x: (B, state_dim) f32. prepared: output of prepare_params().

    Returns (alpha, beta), each (B, action_dim) f32.
    """
    B, state_dim = x.shape
    A = prepared["action_dim"]

    # 2-row lane packing when the batch is even (contiguous reshape is free).
    use_packed = (B % 2 == 0) and (B >= 16)
    if use_packed:
        p = prepared["packed"]
        x_in = x.reshape(B // 2, 2 * state_dim)
        out_cols = 4 * A
    else:
        p = prepared["flat"]
        x_in = x
        out_cols = 2 * A

    rows, in_cols = x_in.shape
    tm = _choose_tile(rows, block_rows)
    grid = (pl.cdiv(rows, tm),)   # last block may be partial: OOB rows masked

    def full_spec(shape):
        return pl.BlockSpec(shape, lambda i: (0,) * len(shape))

    out = pl.pallas_call(
        cts_beta_policy_kernel,
        out_shape=jax.ShapeDtypeStruct((rows, out_cols), jnp.float32),
        grid=grid,
        in_specs=[
            pl.BlockSpec((tm, in_cols), lambda i: (i, 0)),   # x (batch-tiled)
            full_spec(p["w1"].shape),                        # w1
            full_spec(p["b1"].shape),                        # b1
            full_spec(p["w2"].shape),                        # w2
            full_spec(p["b2"].shape),                        # b2
            full_spec(p["wh"].shape),                        # fused head weight
            full_spec(p["bh"].shape),                        # fused head bias
        ],
        out_specs=pl.BlockSpec((tm, out_cols), lambda i: (i, 0)),
        compiler_params=pltpu.CompilerParams(
            dimension_semantics=("parallel",),
        ),
    )(x_in, p["w1"], p["b1"], p["w2"], p["b2"], p["wh"], p["bh"])

    if use_packed:
        out = out.reshape(B, 2 * A)   # free contiguous reshape back

    alpha = out[:, :A]
    beta = out[:, A:]
    return alpha, beta


def xavier_uniform(key, shape):
    fan_in, fan_out = shape
    limit = (6.0 / (fan_in + fan_out)) ** 0.5
    return jax.random.uniform(key, shape, jnp.float32, -limit, limit)


def init_params(key, state_dim, action_dim, hidden_sizes=HIDDEN_SIZES):
    # Deterministic xavier-style init (matches init='xavier'; biases -> zero).
    k1, k2, k3, k4 = jax.random.split(key, 4)
    h1, h2 = hidden_sizes
    return {
        "w1": xavier_uniform(k1, (state_dim, h1)),
        "b1": jnp.zeros((1, h1), jnp.float32),
        "w2": xavier_uniform(k2, (h1, h2)),
        "b2": jnp.zeros((1, h2), jnp.float32),
        "wa": xavier_uniform(k3, (h2, action_dim)),
        "ba": jnp.zeros((1, action_dim), jnp.float32),
        "wb": xavier_uniform(k4, (h2, action_dim)),
        "bb": jnp.zeros((1, action_dim), jnp.float32),
    }


def reference_forward(x, p):
    h = jnp.tanh(x @ p["w1"] + p["b1"])
    h = jnp.tanh(h @ p["w2"] + p["b2"])
    alpha = jax.nn.softplus(h @ p["wa"] + p["ba"]) + 1.0
    beta = jax.nn.softplus(h @ p["wb"] + p["bb"]) + 1.0
    return alpha, beta


if __name__ == "__main__":
    key = jax.random.PRNGKey(0)
    kx, kp = jax.random.split(key)

    batch, state_dim, action_dim = 8, 16, 4
    params = init_params(kp, state_dim, action_dim)
    prepared = prepare_params(params)
    jax.block_until_ready(prepared)   # one-time fusion/packing, hoisted

    def check(b, key):
        xin = jax.random.normal(key, (b, state_dim), jnp.float32)
        a, bt = cts_beta_policy_forward(xin, prepared)
        jax.block_until_ready((a, bt))
        ra, rb = reference_forward(xin, params)
        assert a.shape == (b, action_dim) and bt.shape == (b, action_dim)
        assert jnp.allclose(a, ra, atol=1e-5, rtol=1e-5)
        assert jnp.allclose(bt, rb, atol=1e-5, rtol=1e-5)
        assert bool(jnp.all(a > 1.0)) and bool(jnp.all(bt > 1.0))

    # Small batch (unpacked path, single block).
    check(batch, kx)
    # Even batch, non-multiple of the tile: packed path + ragged last block +
    # a >=2-block "parallel" grid (v7x megacore).
    check(1024 + 24, jax.random.fold_in(kx, 1))
    # Odd batch: unpacked fallback path with a ragged last block.
    check(37, jax.random.fold_in(kx, 2))

    print("KERNEL_OK")
</pallas_src>

<mosaic_0001>
module attributes {stable_mosaic.version = 11 : i64} {
  func.func @cts_beta_policy_kernel(%arg0: i32, %arg1: memref<8x16xf32, #tpu.memory_space<vmem>>, %arg2: memref<16x64xf32, #tpu.memory_space<vmem>>, %arg3: memref<1x64xf32, #tpu.memory_space<vmem>>, %arg4: memref<64x64xf32, #tpu.memory_space<vmem>>, %arg5: memref<1x64xf32, #tpu.memory_space<vmem>>, %arg6: memref<64x8xf32, #tpu.memory_space<vmem>>, %arg7: memref<1x8xf32, #tpu.memory_space<vmem>>, %arg8: memref<8x8xf32, #tpu.memory_space<vmem>>) attributes {dimension_semantics = [#tpu.dimension_semantics<parallel>], iteration_bounds = array<i64: 1>, scalar_prefetch = 0 : i64, scratch_operands = 0 : i64, tpu.core_type = #tpu.core_type<tc>, window_params = [{transform_indices = @transform_0, window_bounds = array<i64: 8, 16>}, {pipeline_mode = #tpu.pipeline_mode<synchronous>, transform_indices = @transform_1, window_bounds = array<i64: 16, 64>}, {pipeline_mode = #tpu.pipeline_mode<synchronous>, transform_indices = @transform_2, window_bounds = array<i64: 1, 64>}, {pipeline_mode = #tpu.pipeline_mode<synchronous>, transform_indices = @transform_3, window_bounds = array<i64: 64, 64>}, {pipeline_mode = #tpu.pipeline_mode<synchronous>, transform_indices = @transform_4, window_bounds = array<i64: 1, 64>}, {pipeline_mode = #tpu.pipeline_mode<synchronous>, transform_indices = @transform_5, window_bounds = array<i64: 64, 8>}, {pipeline_mode = #tpu.pipeline_mode<synchronous>, transform_indices = @transform_6, window_bounds = array<i64: 1, 8>}, {transform_indices = @transform_7, window_bounds = array<i64: 8, 8>}]} {
    %c0 = arith.constant 0 : index
    %c0_0 = arith.constant 0 : index
    %0 = vector.load %arg1[%c0, %c0_0] : memref<8x16xf32, #tpu.memory_space<vmem>>, vector<8x16xf32>
    %c0_1 = arith.constant 0 : index
    %c0_2 = arith.constant 0 : index
    %1 = vector.load %arg2[%c0_1, %c0_2] : memref<16x64xf32, #tpu.memory_space<vmem>>, vector<16x64xf32>
    %cst = arith.constant dense<0.000000e+00> : vector<8x64xf32>
    %2 = tpu.matmul %0, %1, %cst {dimension_numbers = #tpu.dot_dimension_numbers<[1], [0], [0], [1], [0, 0, 1, 1], [], []>} : vector<8x16xf32>, vector<16x64xf32>, vector<8x64xf32> -> vector<8x64xf32>
    %c0_3 = arith.constant 0 : index
    %c0_4 = arith.constant 0 : index
    %3 = vector.load %arg3[%c0_3, %c0_4] : memref<1x64xf32, #tpu.memory_space<vmem>>, vector<1x64xf32>
    %4 = vector.broadcast %3 : vector<1x64xf32> to vector<8x64xf32>
    %5 = arith.addf %2, %4 : vector<8x64xf32>
    %6 = math.tanh %5 : vector<8x64xf32>
    %c0_5 = arith.constant 0 : index
    %c0_6 = arith.constant 0 : index
    %7 = vector.load %arg4[%c0_5, %c0_6] : memref<64x64xf32, #tpu.memory_space<vmem>>, vector<64x64xf32>
    %cst_7 = arith.constant dense<0.000000e+00> : vector<8x64xf32>
    %8 = tpu.matmul %6, %7, %cst_7 {dimension_numbers = #tpu.dot_dimension_numbers<[1], [0], [0], [1], [0, 0, 1, 1], [], []>} : vector<8x64xf32>, vector<64x64xf32>, vector<8x64xf32> -> vector<8x64xf32>
    %c0_8 = arith.constant 0 : index
    %c0_9 = arith.constant 0 : index
    %9 = vector.load %arg5[%c0_8, %c0_9] : memref<1x64xf32, #tpu.memory_space<vmem>>, vector<1x64xf32>
    %10 = vector.broadcast %9 : vector<1x64xf32> to vector<8x64xf32>
    %11 = arith.addf %8, %10 : vector<8x64xf32>
    %12 = math.tanh %11 : vector<8x64xf32>
    %c0_10 = arith.constant 0 : index
    %c0_11 = arith.constant 0 : index
    %13 = vector.load %arg6[%c0_10, %c0_11] : memref<64x8xf32, #tpu.memory_space<vmem>>, vector<64x8xf32>
    %cst_12 = arith.constant dense<0.000000e+00> : vector<8x8xf32>
    %14 = tpu.matmul %12, %13, %cst_12 {dimension_numbers = #tpu.dot_dimension_numbers<[1], [0], [0], [1], [0, 0, 1, 1], [], []>} : vector<8x64xf32>, vector<64x8xf32>, vector<8x8xf32> -> vector<8x8xf32>
    %c0_13 = arith.constant 0 : index
    %c0_14 = arith.constant 0 : index
    %15 = vector.load %arg7[%c0_13, %c0_14] : memref<1x8xf32, #tpu.memory_space<vmem>>, vector<1x8xf32>
    %16 = vector.broadcast %15 : vector<1x8xf32> to vector<8x8xf32>
    %17 = arith.addf %14, %16 : vector<8x8xf32>
    %cst_15 = arith.constant 0.000000e+00 : f32
    %18 = vector.broadcast %cst_15 : f32 to vector<8x8xf32>
    %19 = arith.maximumf %17, %18 : vector<8x8xf32>
    %20 = math.absf %17 : vector<8x8xf32>
    %cst_16 = arith.constant 0.000000e+00 : f32
    %21 = vector.broadcast %cst_16 : f32 to vector<8x8xf32>
    %22 = arith.subf %21, %20 : vector<8x8xf32>
    %23 = math.exp %22 : vector<8x8xf32>
    %24 = math.log1p %23 : vector<8x8xf32>
    %25 = arith.addf %19, %24 : vector<8x8xf32>
    %cst_17 = arith.constant 1.000000e+00 : f32
    %26 = vector.broadcast %cst_17 : f32 to vector<8x8xf32>
    %27 = arith.addf %25, %26 : vector<8x8xf32>
    %c0_18 = arith.constant 0 : index
    %c0_19 = arith.constant 0 : index
    %28 = vector.load %arg8[%c0_18, %c0_19] : memref<8x8xf32, #tpu.memory_space<vmem>>, vector<8x8xf32>
    tpu.vector_store %arg8[%c0_18, %c0_19], %27 {strides = array<i32>} : memref<8x8xf32, #tpu.memory_space<vmem>>, vector<8x8xf32>,
    return
  }
  func.func @transform_0(%arg0: i32) -> (i32, i32) {
    %c0_i32 = arith.constant 0 : i32
    %c0_i32_0 = arith.constant 0 : i32
    return %arg0, %c0_i32 : i32, i32
  }
  func.func @transform_1(%arg0: i32) -> (i32, i32) {
    %c0_i32 = arith.constant 0 : i32
    %c0_i32_0 = arith.constant 0 : i32
    %c0_i32_1 = arith.constant 0 : i32
    return %c0_i32, %c0_i32_0 : i32, i32
  }
  func.func @transform_2(%arg0: i32) -> (i32, i32) {
    %c0_i32 = arith.constant 0 : i32
    %c0_i32_0 = arith.constant 0 : i32
    %c0_i32_1 = arith.constant 0 : i32
    return %c0_i32, %c0_i32_0 : i32, i32
  }
  func.func @transform_3(%arg0: i32) -> (i32, i32) {
    %c0_i32 = arith.constant 0 : i32
    %c0_i32_0 = arith.constant 0 : i32
    %c0_i32_1 = arith.constant 0 : i32
    return %c0_i32, %c0_i32_0 : i32, i32
  }
  func.func @transform_4(%arg0: i32) -> (i32, i32) {
    %c0_i32 = arith.constant 0 : i32
    %c0_i32_0 = arith.constant 0 : i32
    %c0_i32_1 = arith.constant 0 : i32
    return %c0_i32, %c0_i32_0 : i32, i32
  }
  func.func @transform_5(%arg0: i32) -> (i32, i32) {
    %c0_i32 = arith.constant 0 : i32
    %c0_i32_0 = arith.constant 0 : i32
    %c0_i32_1 = arith.constant 0 : i32
    return %c0_i32, %c0_i32_0 : i32, i32
  }
  func.func @transform_6(%arg0: i32) -> (i32, i32) {
    %c0_i32 = arith.constant 0 : i32
    %c0_i32_0 = arith.constant 0 : i32
    %c0_i32_1 = arith.constant 0 : i32
    return %c0_i32, %c0_i32_0 : i32, i32
  }
  func.func @transform_7(%arg0: i32) -> (i32, i32) {
    %c0_i32 = arith.constant 0 : i32
    %c0_i32_0 = arith.constant 0 : i32
    return %arg0, %c0_i32 : i32, i32
  }
}

</mosaic_0001>

<bundles_post_ra>
// kernel: tpu_custom_call.1
= control target key start
LH: loop header
LB: loop body
LE: loop exit
PB: predicated region body
PF: predicated region fallthrough
CT: control target
= control target key end

     0   :  { %12 = vsyncpa [#allocation3], 0  ;;  %s632_s0 = inlined_call_operand.hbm [shape: f32[8,16], index: 0, kind: input, shape index: {}]   ;;  %s633_s1 = inlined_call_operand.vmem [shape: f32[16,64], index: 1, kind: input, shape index: {}]   ;;  %s634_s2 = inlined_call_operand.vmem [shape: f32[1,64], index: 2, kind: input, shape index: {}]   ;;  %s635_s3 = inlined_call_operand.vmem [shape: f32[64,64], index: 3, kind: input, shape index: {}]   ;;  %s636_s4 = inlined_call_operand.vmem [shape: f32[1,64], index: 4, kind: input, shape index: {}]   ;;  %s637_s5 = inlined_call_operand.vmem [shape: f32[64,8], index: 5, kind: input, shape index: {}]   ;;  %s638_s6 = inlined_call_operand.vmem [shape: f32[1,8], index: 6, kind: input, shape index: {}]   ;;  %s639_s7 = inlined_call_operand.hbm [shape: f32[8,8], index: 7, kind: output, shape index: {}]  }
   0x1   :  { %13 = vsyncpa [#allocation4], 0  ;;  %s495_s24 = smov [#allocation2]   ;;  %s447_s28 = scalar_lea.hbm %s632_s0, 128 }
   0x2   :  { %s20_s25 = sshll.u32 %s495_s24, 4  ;;  %p448_p0 = scmp.ne.s32.totalorder %s632_s0, %s447_s28  ;;  %s21_s25 = int_to_ptr.vmem [resolvable:$true] %s20_s25 }
   0x3   :  { %p451_p1 = scmp.lt.u32.totalorder %s447_s28, %s632_s0 }
   0x5   :  { %p453_p2 = pnand %p451_p1, %p448_p0 }
   0x7   :  { %456 = shalt.err (!%p453_p2)
}
   0x8   :  { %s457_s10 = scalar_lea.vmem %s21_s25, 128  ;;  %p462_p4 = scmp.lt.s32.totalorder %s21_s25, %s21_s25 }
   0x9   :  { %p458_p3 = scmp.ne.s32.totalorder %s21_s25, %s457_s10  ;;  %p463_p5 = scmp.lt.s32.totalorder %s457_s10, %s457_s10 }
   0xb   :  { %p464_p6 = por %p463_p5, %p462_p4 }
   0xd   :  { %p465_p7 = pnand %p464_p6, %p458_p3 }
   0xf   :  { %468 = shalt.err (!%p465_p7)
}
  0x10   :  { %23 = dma.hbm_to_vmem [thread:$0]  %s632_s0, 128, %s21_s25, [#allocation3]  }
  0x11   :  { %491 = dma.done.wait [#allocation3], 128  }
  0x12   :  { %492 = vsyncadd [#allocation3], 4294967168  ;;  %v496_v0 = vmov 0.0|0.0   ;;  %vm497_vm0 = vmmov 0   ;;  %v498_v1 = vmov 0.0   ;;  %v40_v2 = vld [vmem:[%s633_s1] sm:$0xff] }
  0x13   :  { %407 = vmatprep.subr.bf16.mxu0 %v496_v0  ;;  %366 = vmatprep.mubr.msk.f32.mxu0 %vm497_vm0, %v498_v1  ;;  %v41_v3 = vld [vmem:[%s633_s1 + $0x8] sm:$0xff]  ;;  %v124_v5 = vld [vmem:[%s635_s3] sm:$0xff]  ;;  %vm49_vm1 = vcmask 130048   ;;  %v126_v9 = vld [vmem:[%s635_s3 + $0x10] sm:$0xff]  ;;  %vm139_vm2 = vcmask 523264   ;;  %vm318_vm4 = vcmask 64512  }
  0x14   :  { %410 = vmatprep.subr.bf16.mxu1 %v496_v0  ;;  %385 = vmatprep.mubr.msk.f32.mxu1 %vm497_vm0, %v498_v1  ;;  %v408_v4 = vpack.c.bf16 %v41_v3, %v40_v2  ;;  %v125_v6 = vld [vmem:[%s635_s3 + $0x8] sm:$0xff]  ;;  %v39_v8 = vld [vmem:[#allocation2] sm:$0xff]  ;;  %v127_v10 = vld [vmem:[%s635_s3 + $0x18] sm:$0xff] }
  0x15   :  { %v411_v7 = vpack.c.bf16 %v125_v6, %v124_v5  ;;  %v414_v11 = vpack.c.bf16 %v127_v10, %v126_v9  ;;  %v128_v12 = vld [vmem:[%s635_s3 + $0x20] sm:$0xff]  ;;  %v129_v13 = vld [vmem:[%s635_s3 + $0x28] sm:$0xff]  ;;  %v130_v15 = vld [vmem:[%s635_s3 + $0x30] sm:$0xff] }
  0x16   :  { %409 = vmatpush3.bf16.msra.mxu0 %v408_v4  ;;  %v417_v14 = vpack.c.bf16 %v129_v13, %v128_v12  ;;  %v131_v16 = vld [vmem:[%s635_s3 + $0x38] sm:$0xff]  ;;  %v214_v18 = vld [vmem:[%s637_s5] sm:$0xff]  ;;  %v215_v19 = vld [vmem:[%s637_s5 + $0x8] sm:$0xff] }
  0x17   :  { %412 = vmatpush3.bf16.msra.mxu1 %v411_v7  ;;  %422 = vmatprep.subr.bf16.mxu0 %v496_v0  ;;  %v420_v17 = vpack.c.bf16 %v131_v16, %v130_v15  ;;  %v423_v20 = vpack.c.bf16 %v215_v19, %v214_v18  ;;  %v335_v21 = vld [vmem:[%s634_s2] ss:$0 sm:$0xff]  ;;  %v216_v26 = vld [vmem:[%s637_s5 + $0x10] sm:$0xff]  ;;  %v217_v27 = vld [vmem:[%s637_s5 + $0x18] sm:$0xff] }
  0x18   :  { %413 = vmatprep.subr.bf16.mxu1 %v496_v0  ;;  %v426_v28 = vpack.c.bf16 %v217_v27, %v216_v26  ;;  %v218_v29 = vld [vmem:[%s637_s5 + $0x20] sm:$0xff]  ;;  %v219_v30 = vld [vmem:[%s637_s5 + $0x28] sm:$0xff]  ;;  %v220_v32 = vld [vmem:[%s637_s5 + $0x30] sm:$0xff] }
  0x19   :  { %367 = vmatmul.mubr.msk.f32.vlgmr.msra.gmra.mrb[0].mxu0 %vm49_vm1, %v39_v8  ;;  %v429_v31 = vpack.c.bf16 %v219_v30, %v218_v29  ;;  %v221_v33 = vld [vmem:[%s637_s5 + $0x38] sm:$0xff]  ;;  %v337_v35 = vld [vmem:[%s636_s4] ss:$0 sm:$0xff]  ;;  %s499_s4 = smov [#allocation5]  }
  0x1a   :  { %404 = vmatprep.mubr.msk.f32.mxu0 %vm497_vm0, %v498_v1  ;;  %424 = vmatpush3.bf16.msra.mxu0 %v423_v20  ;;  %v432_v34 = vpack.c.bf16 %v221_v33, %v220_v32  ;;  %v339_v40 = vld [vmem:[%s638_s6] ss:$0 sm:$0xff]  ;;  %s326_s5 = sshll.u32 %s499_s4, 4  ;;  %s327_s5 = int_to_ptr.vmem [resolvable:$true] %s326_s5 }
  0x1b   :  { %415 = vmatpush3.bf16.msra.mxu1 %v414_v11  ;;  %425 = vmatprep.subr.bf16.mxu0 %v496_v0  ;;  %s469_s6 = scalar_lea.vmem %s327_s5, 128  ;;  %p474_p9 = scmp.lt.s32.totalorder %s327_s5, %s327_s5 }
  0x1c   :  { %416 = vmatprep.subr.bf16.mxu1 %v496_v0  ;;  %p470_p8 = scmp.ne.s32.totalorder %s327_s5, %s469_s6  ;;  %p475_p10 = scmp.lt.s32.totalorder %s469_s6, %s469_s6 }
  0x1e   :  { %427 = vmatpush3.bf16.msra.mxu0 %v426_v28  ;;  %p476_p11 = por %p475_p10, %p474_p9 }
  0x1f   :  { %418 = vmatpush3.bf16.msra.mxu1 %v417_v14  ;;  %428 = vmatprep.subr.bf16.mxu0 %v496_v0 }
  0x20   :  { %419 = vmatprep.subr.bf16.mxu1 %v496_v0  ;;  %p477_p12 = pnand %p476_p11, %p470_p8 }
  0x22   :  { %430 = vmatpush3.bf16.msra.mxu0 %v429_v31 }
  0x23   :  { %421 = vmatpush3.bf16.msra.mxu1 %v420_v17  ;;  %431 = vmatprep.subr.bf16.mxu0 %v496_v0 }
  0x26   :  { %433 = vmatpush3.bf16.msra.mxu0 %v432_v34 }
  0xec   :  { %v119_v22 = vpop.f32.mrb[0].mxu0 }
  0xed   :  { %v120_v23 = vadd.f32 %v335_v21, %v119_v22  ;;  %v368_v24 = vpop.f32.mrb[1].mxu0 }
  0xef   :  { %439 = vtanh.f32 %v120_v23 }
  0xf9   :  { %v440_v25 = vpop.eup %439 }
  0xfa   :  { %386 = vmatmul.mubr.msk.f32.vlgmr.msra.gmra.mrb[0].mxu1 %vm139_vm2, %v440_v25 }
 0x1cd   :  { %v209_v36 = vpop.f32.mrb[0].mxu1 }
 0x1ce   :  { %v210_v37 = vadd.f32 %v337_v35, %v209_v36  ;;  %v387_v38 = vpop.f32.mrb[1].mxu1 }
 0x1d0   :  { %441 = vtanh.f32 %v210_v37 }
 0x1da   :  { %v442_v39 = vpop.eup %441 }
 0x1db   :  { %405 = vmatmul.mubr.msk.f32.vlgmr.msra.gmra.mrb[2].mxu0 %vm139_vm2, %v442_v39 }
 0x2ae   :  { %v298_v41 = vpop.f32.mrb[2].mxu0 }
 0x2af   :  { %v299_v42 = vadd.f32 %v339_v40, %v298_v41  ;;  %v406_v43 = vpop.f32.mrb[3].mxu0 }
 0x2b1   :  { %v303_v44 = vand.u32 2147483647, %v299_v42  ;;  %v302_v55 = vmax.f32 %v299_v42, 0.0 }
 0x2b3   :  { %v304_v45 = vsub.f32 0.0, %v303_v44 }
 0x2b5   :  { %v305_v46 = vmul.f32 1.442695, %v304_v45 }
 0x2b7   :  { %443 = vpow2.f32 %v305_v46 }
 0x2c1   :  { %v444_v47 = vpop.eup %443 }
 0x2c2   :  { %v307_v48 = vadd.f32 1.0, %v444_v47  ;;  %v310_v49 = vmul.f32 -0.5, %v444_v47  ;;  %v313_v51 = vand.u32 2147483647, %v444_v47 }
 0x2c4   :  { %445 = vlog2.f32 %v307_v48  ;;  %v311_v50 = vadd.f32 1.0, %v310_v49  ;;  %vm314_vm3 = vcmp.lt.f32.partialorder %v313_v51, 0.0004427343 }
 0x2c6   :  { %v312_v54 = vmul.f32 %v444_v47, %v311_v50 }
 0x2ce   :  { %v446_v52 = vpop.eup %445 }
 0x2cf   :  { %v309_v53 = vmul.f32 0.6931472, %v446_v52 }
 0x2d1   :  { %v315_v56 = vsel %vm314_vm3, %v312_v54, %v309_v53 }
 0x2d2   :  { %v316_v57 = vadd.f32 %v315_v56, %v302_v55 }
 0x2d4   :  { %v317_v58 = vadd.f32 1.0, %v316_v57 }
 0x2d6   :  { %319 = vst.msk [vmem:[#allocation5] sm:$0xff] %vm318_vm4, %v317_v58 }
 0x2d7   :  { %480 = shalt.err (!%p477_p12)
}
 0x2d8   :  { %s481_s28 = scalar_lea.hbm %s639_s7, 128 }
 0x2d9   :  { %p482_p13 = scmp.ne.s32.totalorder %s639_s7, %s481_s28  ;;  %p485_p0 = scmp.lt.u32.totalorder %s481_s28, %s639_s7 }
 0x2db   :  { %p487_p1 = pnand %p485_p0, %p482_p13 }
 0x2dd   :  { %490 = shalt.err (!%p487_p1)
}
 0x2de   :  { %329 = dma.vmem_to_hbm [thread:$0]  %s327_s5, 128, %s639_s7, [#allocation4]  }
 0x2df   :  { %493 = dma.done.wait [#allocation4], 128  }
 0x2e0   :  { %494 = vsyncadd [#allocation4], 4294967168 }
 0x2e1   :  { %333 = vsyncpa [#allocation3], 1 }
 0x2e2   :  { %334 = vsyncpa [#allocation4], 1 }

</bundles_post_ra>
